<compile_context>
chip_gen: v7x
topology: tpu7x:2x2x1
jax: 0.10.0
libtpu: 0.0.40
codegen_flags: <defaults>
</compile_context>

<pallas_src>
import jax
import jax.numpy as jnp
from jax.experimental import pallas as pl
from jax.experimental.pallas import tpu as pltpu

EPS = 1e-5
LANE = 128


def _round_up(x, m):
    return (x + m - 1) // m * m


# --------------------------- hardware-derived knobs --------------------------
_VMEM_CAP = None


def _vmem_cap():
    """Physical VMEM bytes (falls back to the v7x-conservative 64 MiB)."""
    global _VMEM_CAP
    if _VMEM_CAP is None:
        cap = 64 * 1024 * 1024
        try:
            info_fn = getattr(pltpu, "get_tpu_info", None)
            if info_fn is not None:
                cap = int(info_fn().vmem_capacity_bytes)
        except Exception:
            pass
        _VMEM_CAP = cap
    return _VMEM_CAP


def _compiler_params(n_grid_dims=1):
    # 75% of physical VMEM capped at 96 MiB: ~96 MiB on v5e/v6e (128 MiB parts),
    # ~48 MiB on v7x (64 MiB part) -> headroom either way.
    # NOTE: weights are grid-invariant; single-buffering them (pl.Buffered(1))
    # would reclaim more VMEM on v7x if channel counts grow.
    limit = min(int(0.75 * _vmem_cap()), 96 * 1024 * 1024)
    return pltpu.CompilerParams(
        dimension_semantics=("parallel",) * n_grid_dims,
        vmem_limit_bytes=limit)


def _conv_tm_target():
    # Bigger M tiles on 128 MiB parts (v5e/v6e), conservative on v7x (64 MiB).
    return 1024 if _vmem_cap() >= 100 * 1024 * 1024 else 512


def _row_granule(*dtypes):
    it = min(jnp.dtype(d).itemsize for d in dtypes)
    return 8 if it >= 4 else (16 if it == 2 else 32)


def _use_halo(Ho, Wo, cin_p, cout_p):
    # In-kernel patch reshapes need the W (sublane) dim 8-aligned; keep the f32
    # halo scratch + accumulator comfortably inside VMEM.
    scratch = (Ho + 2) * (Wo + 2) * cin_p * 4
    acc = Ho * Wo * cout_p * 4
    return (Wo % 8 == 0) and (scratch + acc) <= 8 * 1024 * 1024


# ----------------------------- Pallas kernels ------------------------------
def _make_conv3x3_kernel(apply_bn_relu):
    """3x3, stride-1, pad-1 conv over one NHWC image resident in VMEM.

    The input tile is (optionally) passed through the previous BN's per-channel
    scale/shift + ReLU, written into a zero-bordered f32 VMEM scratch, and the
    conv is computed as 9 shifted MXU dots (no im2col in HBM).  Per-channel
    sum / sum-of-squares of the f32 accumulator are emitted for the cross-image
    BatchNorm reduction; the conv output is stored in z_ref.dtype (bf16 on the
    fast path, downcast AFTER the stats are taken)."""
    def kernel(a_ref, scale_ref, shift_ref, w_ref, z_ref, ssum_ref, ssq_ref, pad_ref):
        Ho, Wo, cin_p = a_ref.shape
        cout_p = w_ref.shape[-1]
        y = a_ref[...].astype(jnp.float32)
        if apply_bn_relu:
            y = jnp.maximum(y * scale_ref[...] + shift_ref[...], 0.0)
        pad_ref[...] = jnp.zeros_like(pad_ref)                 # zero halo border
        pad_ref[pl.ds(1, Ho), pl.ds(1, Wo), :] = y
        acc = jnp.zeros((Ho * Wo, cout_p), jnp.float32)
        for t in range(9):                                     # unrolled taps
            kh, kw = divmod(t, 3)
            patch = pad_ref[pl.ds(kh, Ho), pl.ds(kw, Wo), :]   # (Ho, Wo, cin_p) f32
            patch = patch.reshape(Ho * Wo, cin_p).astype(w_ref.dtype)
            acc = acc + jnp.dot(patch, w_ref[t], preferred_element_type=jnp.float32)
        ssum_ref[...] = jnp.sum(acc, axis=0, keepdims=True)
        ssq_ref[...] = jnp.sum(acc * acc, axis=0, keepdims=True)
        z_ref[...] = acc.reshape(Ho, Wo, cout_p).astype(z_ref.dtype)
    return kernel


def _conv_im2col_kernel(a_ref, w_ref, z_ref, ssum_ref, ssq_ref):
    """Fallback conv-as-matmul on an (M, K) im2col tile; emits BN stat rows.
    Padded rows are all-zero so they contribute nothing to the sums."""
    z = jnp.dot(a_ref[...], w_ref[...], preferred_element_type=jnp.float32)
    ssum_ref[...] = jnp.sum(z, axis=0, keepdims=True)
    ssq_ref[...] = jnp.sum(z * z, axis=0, keepdims=True)
    z_ref[...] = z.astype(z_ref.dtype)


def _bn_relu_kernel(z_ref, scale_ref, shift_ref, o_ref):
    """Fallback standalone BN-apply + ReLU (only used when the fused halo conv2
    path is unavailable)."""
    y = z_ref[...].astype(jnp.float32) * scale_ref[...] + shift_ref[...]
    o_ref[...] = jnp.maximum(y, 0.0).astype(o_ref.dtype)


def _bn_add_relu_kernel(z_ref, scale_ref, shift_ref, id_ref, o_ref):
    """Epilogue (stride==1): BN2 apply + direct identity add + ReLU."""
    y = z_ref[...].astype(jnp.float32) * scale_ref[...] + shift_ref[...]
    y = y + id_ref[...].astype(jnp.float32)
    o_ref[...] = jnp.maximum(y, 0.0).astype(o_ref.dtype)


def _bn_ds_add_relu_kernel(z_ref, scale_ref, shift_ref, id_ref, wd_ref, bd_ref, o_ref):
    """Epilogue (stride!=1): BN2 apply + fused 1x1 downsample matmul on the
    identity branch (+ its bias) + ReLU."""
    y = z_ref[...].astype(jnp.float32) * scale_ref[...] + shift_ref[...]
    ident = jnp.dot(id_ref[...], wd_ref[...], preferred_element_type=jnp.float32)
    o_ref[...] = jnp.maximum(y + ident + bd_ref[...], 0.0).astype(o_ref.dtype)


# --------------------------- pallas_call wrappers ----------------------------
def _conv3x3_halo(a, scale, shift, w_taps, *, apply_bn_relu, out_dtype):
    """a: (N, Ho, Wo, cin_p), w_taps: (9, cin_p, cout_p)."""
    N, Ho, Wo, cin_p = a.shape
    cout_p = w_taps.shape[-1]
    zb = jnp.dtype(out_dtype).itemsize
    cost = pl.CostEstimate(
        flops=2 * N * Ho * Wo * 9 * cin_p * cout_p,
        transcendentals=0,
        bytes_accessed=(a.size * a.dtype.itemsize + w_taps.size * w_taps.dtype.itemsize
                        + N * Ho * Wo * cout_p * zb + 2 * N * cout_p * 4))
    return pl.pallas_call(
        _make_conv3x3_kernel(apply_bn_relu),
        out_shape=(jax.ShapeDtypeStruct((N, Ho, Wo, cout_p), out_dtype),
                   jax.ShapeDtypeStruct((N, 1, cout_p), jnp.float32),
                   jax.ShapeDtypeStruct((N, 1, cout_p), jnp.float32)),
        grid_spec=pltpu.PrefetchScalarGridSpec(
            num_scalar_prefetch=0,
            grid=(N,),
            in_specs=[pl.BlockSpec((None, Ho, Wo, cin_p), lambda n: (n, 0, 0, 0)),
                      pl.BlockSpec((1, cin_p), lambda n: (0, 0)),
                      pl.BlockSpec((1, cin_p), lambda n: (0, 0)),
                      pl.BlockSpec((9, cin_p, cout_p), lambda n: (0, 0, 0))],
            out_specs=[pl.BlockSpec((None, Ho, Wo, cout_p), lambda n: (n, 0, 0, 0)),
                       pl.BlockSpec((None, 1, cout_p), lambda n: (n, 0, 0)),
                       pl.BlockSpec((None, 1, cout_p), lambda n: (n, 0, 0))],
            scratch_shapes=[pltpu.VMEM((Ho + 2, Wo + 2, cin_p), jnp.float32)]),
        compiler_params=_compiler_params(1),
        cost_estimate=cost,
    )(a, scale, shift, w_taps)


def _conv_im2col(a, w, tm):
    m_pad, k_pad = a.shape
    cout_p = w.shape[1]
    nt = m_pad // tm
    cost = pl.CostEstimate(
        flops=2 * m_pad * k_pad * cout_p, transcendentals=0,
        bytes_accessed=(a.size * a.dtype.itemsize + w.size * w.dtype.itemsize
                        + m_pad * cout_p * a.dtype.itemsize + 2 * nt * cout_p * 4))
    return pl.pallas_call(
        _conv_im2col_kernel,
        out_shape=(jax.ShapeDtypeStruct((m_pad, cout_p), a.dtype),
                   jax.ShapeDtypeStruct((nt, 1, cout_p), jnp.float32),
                   jax.ShapeDtypeStruct((nt, 1, cout_p), jnp.float32)),
        grid_spec=pltpu.PrefetchScalarGridSpec(
            num_scalar_prefetch=0,
            grid=(nt,),
            in_specs=[pl.BlockSpec((tm, k_pad), lambda i: (i, 0)),
                      pl.BlockSpec((k_pad, cout_p), lambda i: (0, 0))],   # resident weights
            out_specs=[pl.BlockSpec((tm, cout_p), lambda i: (i, 0)),
                       pl.BlockSpec((None, 1, cout_p), lambda i: (i, 0, 0)),
                       pl.BlockSpec((None, 1, cout_p), lambda i: (i, 0, 0))]),
        compiler_params=_compiler_params(1),
        cost_estimate=cost,
    )(a, w)


def _bn_relu(z, scale, shift, tm, out_dtype):
    m_pad, c_pad = z.shape
    nt = m_pad // tm
    cost = pl.CostEstimate(
        flops=3 * m_pad * c_pad, transcendentals=0,
        bytes_accessed=z.size * z.dtype.itemsize + 2 * c_pad * 4
        + m_pad * c_pad * jnp.dtype(out_dtype).itemsize)
    return pl.pallas_call(
        _bn_relu_kernel,
        out_shape=jax.ShapeDtypeStruct((m_pad, c_pad), out_dtype),
        grid_spec=pltpu.PrefetchScalarGridSpec(
            num_scalar_prefetch=0,
            grid=(nt,),
            in_specs=[pl.BlockSpec((tm, c_pad), lambda i: (i, 0)),
                      pl.BlockSpec((1, c_pad), lambda i: (0, 0)),
                      pl.BlockSpec((1, c_pad), lambda i: (0, 0))],
            out_specs=pl.BlockSpec((tm, c_pad), lambda i: (i, 0))),
        compiler_params=_compiler_params(1),
        cost_estimate=cost,
    )(z, scale, shift)


def _bn_add_relu(z, scale, shift, ident, tm, out_dtype):
    m_pad, c_pad = z.shape
    nt = m_pad // tm
    cost = pl.CostEstimate(
        flops=4 * m_pad * c_pad, transcendentals=0,
        bytes_accessed=(z.size * z.dtype.itemsize + ident.size * ident.dtype.itemsize
                        + m_pad * c_pad * jnp.dtype(out_dtype).itemsize))
    return pl.pallas_call(
        _bn_add_relu_kernel,
        out_shape=jax.ShapeDtypeStruct((m_pad, c_pad), out_dtype),
        grid_spec=pltpu.PrefetchScalarGridSpec(
            num_scalar_prefetch=0,
            grid=(nt,),
            in_specs=[pl.BlockSpec((tm, c_pad), lambda i: (i, 0)),
                      pl.BlockSpec((1, c_pad), lambda i: (0, 0)),
                      pl.BlockSpec((1, c_pad), lambda i: (0, 0)),
                      pl.BlockSpec((tm, c_pad), lambda i: (i, 0))],
            out_specs=pl.BlockSpec((tm, c_pad), lambda i: (i, 0))),
        compiler_params=_compiler_params(1),
        cost_estimate=cost,
    )(z, scale, shift, ident)


def _bn_ds_add_relu(z, scale, shift, ident, wd, bd, tm, out_dtype):
    m_pad, c_pad = z.shape
    cin_p = ident.shape[1]
    nt = m_pad // tm
    cost = pl.CostEstimate(
        flops=2 * m_pad * cin_p * c_pad + 5 * m_pad * c_pad, transcendentals=0,
        bytes_accessed=(z.size * z.dtype.itemsize + ident.size * ident.dtype.itemsize
                        + wd.size * wd.dtype.itemsize
                        + m_pad * c_pad * jnp.dtype(out_dtype).itemsize))
    return pl.pallas_call(
        _bn_ds_add_relu_kernel,
        out_shape=jax.ShapeDtypeStruct((m_pad, c_pad), out_dtype),
        grid_spec=pltpu.PrefetchScalarGridSpec(
            num_scalar_prefetch=0,
            grid=(nt,),
            in_specs=[pl.BlockSpec((tm, c_pad), lambda i: (i, 0)),
                      pl.BlockSpec((1, c_pad), lambda i: (0, 0)),
                      pl.BlockSpec((1, c_pad), lambda i: (0, 0)),
                      pl.BlockSpec((tm, cin_p), lambda i: (i, 0)),
                      pl.BlockSpec((cin_p, c_pad), lambda i: (0, 0)),
                      pl.BlockSpec((1, c_pad), lambda i: (0, 0))],
            out_specs=pl.BlockSpec((tm, c_pad), lambda i: (i, 0))),
        compiler_params=_compiler_params(1),
        cost_estimate=cost,
    )(z, scale, shift, ident, wd, bd)


# ------------------------------- glue (JAX) ---------------------------------
def _im2col(x_nhwc, ksize, stride, pad):
    """x: (N,H,W,C) -> (N*Ho*Wo, ksize*ksize*C), (kh,kw,c) fastest-last order."""
    N, H, W, C = x_nhwc.shape
    xp = jnp.pad(x_nhwc, ((0, 0), (pad, pad), (pad, pad), (0, 0)))
    Ho = (H + 2 * pad - ksize) // stride + 1
    Wo = (W + 2 * pad - ksize) // stride + 1
    cols = []
    for kh in range(ksize):
        for kw in range(ksize):
            cols.append(xp[:, kh:kh + stride * Ho:stride, kw:kw + stride * Wo:stride, :])
    a = jnp.stack(cols, axis=-2)                      # (N,Ho,Wo,k*k,C)
    return a.reshape(N * Ho * Wo, ksize * ksize * C), (Ho, Wo)


def _conv_w_to_taps(w, cin_p, cout_p, dtype):
    """(Cout,Cin,3,3) -> (9, cin_p, cout_p), tap index = kh*3+kw, channel-padded."""
    cout, cin, kh, kw = w.shape
    wt = jnp.transpose(w, (2, 3, 1, 0))               # (KH,KW,Cin,Cout)
    wt = jnp.pad(wt, ((0, 0), (0, 0), (0, cin_p - cin), (0, cout_p - cout)))
    return wt.reshape(kh * kw, cin_p, cout_p).astype(dtype)


def _conv_w_to_mat(w, k_pad, cout_pad):
    """(Cout,Cin,KH,KW) -> (k_pad, cout_pad), (kh,kw,cin) row order, tail zero-pad."""
    cout, cin, kh, kw = w.shape
    m = jnp.transpose(w, (2, 3, 1, 0)).reshape(kh * kw * cin, cout)
    return jnp.pad(m, ((0, k_pad - kh * kw * cin), (0, cout_pad - cout)))


def _conv_w_to_mat_chanpad(w, cin_pad, cout_pad):
    """(Cout,Cin,KH,KW) -> (KH*KW*cin_pad, cout_pad): per-tap input-channel padding."""
    cout, cin, kh, kw = w.shape
    wt = jnp.transpose(w, (2, 3, 1, 0))
    wt = jnp.pad(wt, ((0, 0), (0, 0), (0, cin_pad - cin), (0, cout_pad - cout)))
    return wt.reshape(kh * kw * cin_pad, cout_pad)


def _pad_vec(v, n, val=0.0):
    return jnp.pad(v.astype(jnp.float32), (0, n - v.shape[0]),
                   constant_values=val).reshape(1, n)


def _bn_scale_shift(ssum, ssq, m_true, gamma, beta, c_pad):
    """Reduce per-tile [sum, sumsq] into one per-channel scale/shift vector (f32).
    Padded rows contribute exact zeros, so dividing by the true M is correct."""
    s = jnp.sum(ssum[:, 0, :], axis=0)
    q = jnp.sum(ssq[:, 0, :], axis=0)
    mean = s / m_true
    var = jnp.maximum(q / m_true - mean * mean, 0.0)   # biased var (PyTorch BN, training)
    inv_std = jax.lax.rsqrt(var + EPS)
    g = jnp.pad(gamma.astype(jnp.float32), (0, c_pad - gamma.shape[0]), constant_values=1.0)
    b = jnp.pad(beta.astype(jnp.float32), (0, c_pad - beta.shape[0]))
    scale = g * inv_std
    shift = b - mean * scale
    return scale.reshape(1, c_pad), shift.reshape(1, c_pad)


def block_forward(x_nchw, params, stride, *, compute_dtype=jnp.bfloat16, out_dtype=None):
    """Pallas implementation of Block.forward. Input NCHW like PyTorch; output
    NCHW in out_dtype (defaults to compute_dtype so chained blocks stay bf16)."""
    if out_dtype is None:
        out_dtype = compute_dtype
    granule = _row_granule(compute_dtype, out_dtype)

    # Cast first so every downstream pad / im2col / reshape works on compute_dtype.
    xc = jnp.transpose(x_nchw.astype(compute_dtype), (0, 2, 3, 1))   # NHWC
    N, H, W, Cin = xc.shape
    Cout = params["w1"].shape[0]
    cin_p = _round_up(Cin, LANE)
    cout_p = _round_up(Cout, LANE)
    epi_target = 2048                                 # big tile for HBM-roofline passes
    # NOTE: conv biases b1/b2 are omitted: training-mode BN's mean subtraction
    # cancels them exactly (downsample bias bd is kept).

    # ---- stage 1: conv1 (3x3, stride) + BN1 batch statistics -------------------
    if stride == 1 and _use_halo(H, W, cin_p, cout_p):
        Ho, Wo = H, W
        x_p = jnp.pad(xc, ((0, 0), (0, 0), (0, 0), (0, cin_p - Cin)))
        ones = jnp.ones((1, cin_p), jnp.float32)
        zeros = jnp.zeros((1, cin_p), jnp.float32)
        w1t = _conv_w_to_taps(params["w1"], cin_p, cout_p, compute_dtype)
        z1, s1, q1 = _conv3x3_halo(x_p, ones, zeros, w1t,
                                   apply_bn_relu=False, out_dtype=compute_dtype)
    else:
        # TODO(synk): strided in-kernel patch gather for stride!=1 (still im2col).
        a1, (Ho, Wo) = _im2col(xc, 3, stride, 1)
        M1 = N * Ho * Wo
        k1_p = _round_up(a1.shape[1], LANE)
        tm1 = max(granule, min(_conv_tm_target(), _round_up(pl.cdiv(M1, 2), granule)))
        m1_pad = _round_up(M1, tm1)
        a1p = jnp.pad(a1, ((0, m1_pad - M1), (0, k1_p - a1.shape[1])))
        w1m = _conv_w_to_mat(params["w1"], k1_p, cout_p).astype(compute_dtype)
        z1f, s1, q1 = _conv_im2col(a1p, w1m, tm1)
        z1 = z1f[:M1].reshape(N, Ho, Wo, cout_p)
    M = N * Ho * Wo
    scale1, shift1 = _bn_scale_shift(s1, q1, M, params["g1"], params["beta1"], cout_p)

    # ---- stage 2: BN1-apply + ReLU fused into conv2 (3x3, stride 1) + BN2 stats -
    if _use_halo(Ho, Wo, cout_p, cout_p):
        w2t = _conv_w_to_taps(params["w2"], cout_p, cout_p, compute_dtype)
        z2, s2, q2 = _conv3x3_halo(z1, scale1, shift1, w2t,
                                   apply_bn_relu=True, out_dtype=compute_dtype)
        z2f = z2.reshape(M, cout_p)
    else:
        # Fallback: standalone BN1+ReLU pass, then im2col conv2 (keeps the
        # channel-padded layout between the two convs; no repack needed).
        tm_e = max(granule, min(epi_target, _round_up(pl.cdiv(M, 2), granule)))
        m_e = _round_up(M, tm_e)
        z1p = jnp.pad(z1.reshape(M, cout_p), ((0, m_e - M), (0, 0)))
        y1 = _bn_relu(z1p, scale1, shift1, tm_e, compute_dtype)
        y1 = y1[:M].reshape(N, Ho, Wo, cout_p)
        a2, _ = _im2col(y1, 3, 1, 1)
        tm2 = max(granule, min(_conv_tm_target(), _round_up(pl.cdiv(M, 2), granule)))
        m2_pad = _round_up(M, tm2)
        a2p = jnp.pad(a2, ((0, m2_pad - M), (0, 0)))
        w2m = _conv_w_to_mat_chanpad(params["w2"], cout_p, cout_p).astype(compute_dtype)
        z2full, s2, q2 = _conv_im2col(a2p, w2m, tm2)
        z2f = z2full[:M]
    scale2, shift2 = _bn_scale_shift(s2, q2, M, params["g2"], params["beta2"], cout_p)

    # ---- stage 3: BN2 apply + residual (+ fused 1x1 downsample) + ReLU ---------
    tm_epi = max(granule, min(epi_target, _round_up(pl.cdiv(M, 2), granule)))
    m_epi = _round_up(M, tm_epi)
    z2p = z2f if m_epi == M else jnp.pad(z2f, ((0, m_epi - M), (0, 0)))
    if stride != 1:
        ident = xc[:, ::stride, ::stride, :].reshape(M, Cin)
        identp = jnp.pad(ident, ((0, m_epi - M), (0, cin_p - Cin)))
        wd = params["wd"].reshape(Cout, Cin).T                    # 1x1 conv as matmul
        wdp = jnp.pad(wd, ((0, cin_p - Cin), (0, cout_p - Cout))).astype(compute_dtype)
        bdp = _pad_vec(params["bd"], cout_p)
        y2 = _bn_ds_add_relu(z2p, scale2, shift2, identp, wdp, bdp, tm_epi, out_dtype)
    else:
        assert Cin == Cout, "stride==1 residual add requires input_dim == output_dim"
        identp = jnp.pad(xc.reshape(M, Cin), ((0, m_epi - M), (0, cout_p - Cin)))
        y2 = _bn_add_relu(z2p, scale2, shift2, identp, tm_epi, out_dtype)

    out = y2[:M, :Cout].reshape(N, Ho, Wo, Cout)
    return jnp.transpose(out, (0, 3, 1, 2))                       # -> NCHW


# --------------------------- pure-JAX reference ------------------------------
def block_forward_ref(x_nchw, params, stride):
    x = jnp.transpose(x_nchw, (0, 2, 3, 1)).astype(jnp.float32)

    def conv(x, w, b, s, pad):
        y = jax.lax.conv_general_dilated(
            x, jnp.transpose(w, (2, 3, 1, 0)),
            window_strides=(s, s), padding=[(pad, pad), (pad, pad)],
            dimension_numbers=("NHWC", "HWIO", "NHWC"))
        return y + b

    def bn(y, g, beta):
        m = jnp.mean(y, axis=(0, 1, 2), keepdims=True)
        v = jnp.mean((y - m) ** 2, axis=(0, 1, 2), keepdims=True)
        return (y - m) * jax.lax.rsqrt(v + EPS) * g + beta

    h = jax.nn.relu(bn(conv(x, params["w1"], params["b1"], stride, 1),
                       params["g1"], params["beta1"]))
    h = bn(conv(h, params["w2"], params["b2"], 1, 1), params["g2"], params["beta2"])
    if stride != 1:
        ident = conv(x, params["wd"], params["bd"], stride, 0)
    else:
        ident = x
    out = jax.nn.relu(h + ident)
    return jnp.transpose(out, (0, 3, 1, 2))


# ---------------------------------- main -------------------------------------
if __name__ == "__main__":
    key = jax.random.PRNGKey(0)

    def make_params(k, cin, cout):
        ks = jax.random.split(k, 6)
        return {
            "w1": 0.2 * jax.random.normal(ks[0], (cout, cin, 3, 3), jnp.float32),
            "b1": 0.1 * jax.random.normal(ks[1], (cout,), jnp.float32),
            "w2": 0.2 * jax.random.normal(ks[2], (cout, cout, 3, 3), jnp.float32),
            "b2": 0.1 * jax.random.normal(ks[3], (cout,), jnp.float32),
            "wd": 0.2 * jax.random.normal(ks[4], (cout, cin, 1, 1), jnp.float32),
            "bd": 0.1 * jax.random.normal(ks[5], (cout,), jnp.float32),
            "g1": jnp.ones((cout,), jnp.float32), "beta1": jnp.zeros((cout,), jnp.float32),
            "g2": jnp.ones((cout,), jnp.float32), "beta2": jnp.zeros((cout,), jnp.float32),
        }

    k1, k2, k3, k4 = jax.random.split(key, 4)

    # --- test 1: stride=2 (downsample branch): im2col conv1 + halo conv2. -------
    N, Cin, H, W, Cout = 2, 4, 16, 16, 8
    params = make_params(k1, Cin, Cout)
    x = jax.random.normal(k2, (N, Cin, H, W), jnp.float32)
    ref = jax.block_until_ready(block_forward_ref(x, params, 2))

    out_f32 = jax.block_until_ready(
        block_forward(x, params, 2, compute_dtype=jnp.float32))   # exactness path
    assert out_f32.shape == (N, Cout, H // 2, W // 2), out_f32.shape
    assert jnp.allclose(out_f32, ref, rtol=1e-4, atol=1e-4), \
        float(jnp.max(jnp.abs(out_f32 - ref)))

    out_bf16 = jax.block_until_ready(
        block_forward(x, params, 2, compute_dtype=jnp.bfloat16))  # fast (MXU-native) path
    assert jnp.allclose(out_bf16.astype(jnp.float32), ref, rtol=1e-1, atol=1e-1), \
        float(jnp.max(jnp.abs(out_bf16.astype(jnp.float32) - ref)))

    # --- test 2: stride=1 (identity passthrough): halo conv1 + fused halo conv2. -
    Cin2 = Cout2 = 8
    params2 = make_params(k3, Cin2, Cout2)
    x2 = jax.random.normal(k4, (N, Cin2, H, W), jnp.float32)
    ref2 = jax.block_until_ready(block_forward_ref(x2, params2, 1))

    out2_f32 = jax.block_until_ready(
        block_forward(x2, params2, 1, compute_dtype=jnp.float32))
    assert out2_f32.shape == (N, Cout2, H, W), out2_f32.shape
    assert jnp.allclose(out2_f32, ref2, rtol=1e-4, atol=1e-4), \
        float(jnp.max(jnp.abs(out2_f32 - ref2)))

    out2_bf16 = jax.block_until_ready(
        block_forward(x2, params2, 1, compute_dtype=jnp.bfloat16))
    assert jnp.allclose(out2_bf16.astype(jnp.float32), ref2, rtol=1e-1, atol=1e-1), \
        float(jnp.max(jnp.abs(out2_bf16.astype(jnp.float32) - ref2)))

    print("KERNEL_OK")
</pallas_src>

<mosaic_0001>
module attributes {stable_mosaic.version = 11 : i64} {
  func.func @_conv_im2col_kernel(%arg0: i32, %arg1: memref<64x128xf32, #tpu.memory_space<vmem>>, %arg2: memref<128x128xf32, #tpu.memory_space<vmem>>, %arg3: memref<64x128xf32, #tpu.memory_space<vmem>>, %arg4: memref<1x1x128xf32, #tpu.memory_space<vmem>>, %arg5: memref<1x1x128xf32, #tpu.memory_space<vmem>>) attributes {dimension_semantics = [#tpu.dimension_semantics<parallel>], iteration_bounds = array<i64: 2>, scalar_prefetch = 0 : i64, scratch_operands = 0 : i64, tpu.core_type = #tpu.core_type<tc>, window_params = [{transform_indices = @transform_0, window_bounds = array<i64: 64, 128>}, {pipeline_mode = #tpu.pipeline_mode<synchronous>, transform_indices = @transform_1, window_bounds = array<i64: 128, 128>}, {transform_indices = @transform_2, window_bounds = array<i64: 64, 128>}, {transform_indices = @transform_3, window_bounds = array<i64: 1, 1, 128>}, {transform_indices = @transform_4, window_bounds = array<i64: 1, 1, 128>}]} {
    %c0 = arith.constant 0 : index
    %c0_0 = arith.constant 0 : index
    %0 = vector.load %arg1[%c0, %c0_0] : memref<64x128xf32, #tpu.memory_space<vmem>>, vector<64x128xf32>
    %c0_1 = arith.constant 0 : index
    %c0_2 = arith.constant 0 : index
    %1 = vector.load %arg2[%c0_1, %c0_2] : memref<128x128xf32, #tpu.memory_space<vmem>>, vector<128x128xf32>
    %cst = arith.constant dense<0.000000e+00> : vector<64x128xf32>
    %2 = tpu.matmul %0, %1, %cst {dimension_numbers = #tpu.dot_dimension_numbers<[1], [0], [0], [1], [0, 0, 1, 1], [], []>} : vector<64x128xf32>, vector<128x128xf32>, vector<64x128xf32> -> vector<64x128xf32>
    %cst_3 = arith.constant dense<0.000000e+00> : vector<128xf32>
    %3 = vector.multi_reduction <add>, %2, %cst_3 [0] : vector<64x128xf32> to vector<128xf32>
    %4 = vector.shape_cast %3 : vector<128xf32> to vector<1x128xf32>
    %c0_4 = arith.constant 0 : index
    %c0_5 = arith.constant 0 : index
    %c0_6 = arith.constant 0 : index
    %5 = vector.load %arg4[%c0_4, %c0_5, %c0_6] : memref<1x1x128xf32, #tpu.memory_space<vmem>>, vector<1x1x128xf32>
    %6 = vector.shape_cast %5 : vector<1x1x128xf32> to vector<1x128xf32>
    %7 = vector.shape_cast %4 : vector<1x128xf32> to vector<1x1x128xf32>
    tpu.vector_store %arg4[%c0_4, %c0_5, %c0_6], %7 {strides = array<i32>} : memref<1x1x128xf32, #tpu.memory_space<vmem>>, vector<1x1x128xf32>,
    %8 = arith.mulf %2, %2 : vector<64x128xf32>
    %cst_7 = arith.constant dense<0.000000e+00> : vector<128xf32>
    %9 = vector.multi_reduction <add>, %8, %cst_7 [0] : vector<64x128xf32> to vector<128xf32>
    %10 = vector.shape_cast %9 : vector<128xf32> to vector<1x128xf32>
    %c0_8 = arith.constant 0 : index
    %c0_9 = arith.constant 0 : index
    %c0_10 = arith.constant 0 : index
    %11 = vector.load %arg5[%c0_8, %c0_9, %c0_10] : memref<1x1x128xf32, #tpu.memory_space<vmem>>, vector<1x1x128xf32>
    %12 = vector.shape_cast %11 : vector<1x1x128xf32> to vector<1x128xf32>
    %13 = vector.shape_cast %10 : vector<1x128xf32> to vector<1x1x128xf32>
    tpu.vector_store %arg5[%c0_8, %c0_9, %c0_10], %13 {strides = array<i32>} : memref<1x1x128xf32, #tpu.memory_space<vmem>>, vector<1x1x128xf32>,
    %c0_11 = arith.constant 0 : index
    %c0_12 = arith.constant 0 : index
    %14 = vector.load %arg3[%c0_11, %c0_12] : memref<64x128xf32, #tpu.memory_space<vmem>>, vector<64x128xf32>
    tpu.vector_store %arg3[%c0_11, %c0_12], %2 {strides = array<i32>} : memref<64x128xf32, #tpu.memory_space<vmem>>, vector<64x128xf32>,
    return
  }
  func.func @transform_0(%arg0: i32) -> (i32, i32) {
    %c0_i32 = arith.constant 0 : i32
    %c0_i32_0 = arith.constant 0 : i32
    return %arg0, %c0_i32 : i32, i32
  }
  func.func @transform_1(%arg0: i32) -> (i32, i32) {
    %c0_i32 = arith.constant 0 : i32
    %c0_i32_0 = arith.constant 0 : i32
    %c0_i32_1 = arith.constant 0 : i32
    return %c0_i32, %c0_i32_0 : i32, i32
  }
  func.func @transform_2(%arg0: i32) -> (i32, i32) {
    %c0_i32 = arith.constant 0 : i32
    %c0_i32_0 = arith.constant 0 : i32
    return %arg0, %c0_i32 : i32, i32
  }
  func.func @transform_3(%arg0: i32) -> (i32, i32, i32) {
    %c0_i32 = arith.constant 0 : i32
    %c0_i32_0 = arith.constant 0 : i32
    %c0_i32_1 = arith.constant 0 : i32
    return %arg0, %c0_i32, %c0_i32_0 : i32, i32, i32
  }
  func.func @transform_4(%arg0: i32) -> (i32, i32, i32) {
    %c0_i32 = arith.constant 0 : i32
    %c0_i32_0 = arith.constant 0 : i32
    %c0_i32_1 = arith.constant 0 : i32
    return %arg0, %c0_i32, %c0_i32_0 : i32, i32, i32
  }
}

</mosaic_0001>

<bundles_post_ra>
// kernel: tpu_custom_call.1
= control target key start
LH: loop header
LB: loop body
LE: loop exit
PB: predicated region body
PF: predicated region fallthrough
CT: control target
= control target key end

     0   :  { %10 = vsyncpa [#allocation3], 0  ;;  %s1330_s0 = inlined_call_operand.hbm [shape: f32[128,128], index: 0, kind: input, shape index: {}]   ;;  %s1331_s1 = inlined_call_operand.hbm [shape: f32[128,128], index: 1, kind: input, shape index: {}]   ;;  %s1332_s2 = inlined_call_operand.hbm [shape: f32[128,128], index: 2, kind: output, shape index: {0}]   ;;  %s1333_s3 = inlined_call_operand.hbm [shape: f32[2,1,128], index: 3, kind: output, shape index: {1}]   ;;  %s1334_s4 = inlined_call_operand.hbm [shape: f32[2,1,128], index: 4, kind: output, shape index: {2}]  }
   0x1   :  { %12 = vsyncpa [#allocation3 + $0x1], 0 }
   0x2   :  { %13 = vsyncpa [#allocation6], 0 }
   0x3   :  { %14 = vsyncpa [#allocation4], 0 }
   0x4   :  { %16 = vsyncpa [#allocation4 + $0x1], 0 }
   0x5   :  { %17 = vsyncpa [#allocation9], 0 }
   0x6   :  { %19 = vsyncpa [#allocation9 + $0x1], 0  ;;  %s1037_s15 = smov 0   ;;  %s1039_s16 = smov 0  }
   0x7   :  { %s1041_s17 = smov 0   ;;  %s1043_s18 = smov 0  }
   0x8 LB: > { %s1058_s19 = sadd.s32 4294967295, %s1001_s18   ;;  %s606_s20 = sadd.s32 4294967294, %s1001_s18   ;;  %s1001_s18 = sphi %s1043_s18, %s1354_s18   ;;  %s997_s17 = sphi %s1041_s17, %s1353_s17   ;;  %s993_s16 = sphi %s1039_s16, %s1352_s16   ;;  %s989_s15 = sphi %s1037_s15, %s1351_s15  }
   0x9   : > { %p45_p0 = scmp.ne.s32.totalorder %s993_s16, %s989_s15  ;;  %p1335_p1 = scmp.eq.s32.totalorder %s1058_s19, 0 }
   0xa   : > { %p96_p3 = scmp.eq.s32.totalorder %s606_s20, 1  ;;  %p607_p5 = scmp.ge.s32.totalorder %s1001_s18, 1 }
   0xb   : > { %p1069_p4 = por %p1335_p1, %p45_p0  ;;  %p155_p7 = scmp.lt.s32.totalorder %s1001_s18, 3 }
   0xc   : > { %p1074_p6 = por %p96_p3, %p45_p0  ;;  %s1003_s24 = smov [#allocation5]  }
   0xd   : > { %s1338_s21 = scalar_select %p1069_p4, 1, 0 }
   0xe   : > { %s1339_s22 = scalar_select %p1074_p6, 1, 0 }
   0xf   : > { %p1079_p8 = pnand %p607_p5, %p155_p7  ;;  %s167_s25 = sshll.u32 %s1003_s24, 4  ;;  %s1083_s25 = int_to_ptr.vmem [resolvable:$true] %s167_s25 }
  0x10   : > { %s1095_s27 = sadd.s32 1, %s1001_s18   ;;  %s32_s28 = sadd.s32 1, %s997_s17 }
  0x11   : > { %s1340_s23 = scalar_select %p1079_p8, 1, 0 }
  0x12   : > { %p754_p9 = pneg %p1079_p8  ;;  %s29_s29 = ssub.s32 %s1001_s18, %s1095_s27 }
  0x13   : > { %s813_s6 = scalar_lea.hbm %s1331_s1, 2048 }
  0x14   : > { %p1090_p11 = pnand %p754_p9, %p1335_p1  ;;  %p814_p12 = scmp.ne.s32.totalorder %s1331_s1, %s813_s6 }
  0x15   : > { %p820_p5 = scmp.lt.u32.totalorder %s813_s6, %s1331_s1 }
  0x16   : > { %p815_p13 = pneg %p1090_p11 }
  0x18   : > { %p816_p0 = pnand %p815_p13, %p814_p12 }
  0x1a   : > { %p817_p3 = pneg %p816_p0 }
  0x1c   : > { %p822_p7 = pnand %p820_p5, %p817_p3 }
  0x1e   : > { %825 = shalt.err (!%p822_p7)
}
  0x1f   : > { %s826_s11 = scalar_lea.vmem %s1083_s25, 2048  ;;  %p834_p2 = scmp.lt.s32.totalorder %s1083_s25, %s1083_s25 }
  0x20   : > { %p827_p9 = scmp.ne.s32.totalorder %s1083_s25, %s826_s11  ;;  %p835_p6 = scmp.lt.s32.totalorder %s826_s11, %s826_s11 }
  0x22   : > { %p829_p10 = pnand %p827_p9, %p815_p13  ;;  %p836_p4 = por %p835_p6, %p834_p2 }
  0x24   : > { %p830_p1 = pneg %p829_p10 }
  0x26   : > { %p837_p8 = pnand %p836_p4, %p830_p1 }
  0x28   : > { %840 = shalt.err (!%p837_p8)
}
  0x29   : > { %s1004_s12 = smov 128   ;;  %s1005_s13 = smov 8  }
  0x2a   : > { %757 = dma.hbm_to_vmem [thread:$0]  (!%p1090_p11), %s1331_s1, 2048, %s1083_s25, [#allocation6], %s1004_s12, %s1004_s12, %s1005_s13  }
  0x2b   : > { %p30_p1 = scmp.eq.s32.totalorder %s29_s29, 0  ;;  %p39_p2 = scmp.ne.s32.totalorder %s997_s17, %s993_s16 }
  0x2c   : > { %p40_p4 = scmp.eq.s32.totalorder %s1001_s18, 0  ;;  %p773_p6 = scmp.lt.s32.totalorder %s1001_s18, 2 }
  0x2d   : > { %s1129_s30 = scalar_select %p30_p1, %s997_s17, %s32_s28  }
  0x2e   : > { %p41_p8 = por %p40_p4, %p39_p2  ;;  %p1342_p10 = scmp.eq.s32.totalorder %s1058_s19, 1 }
  0x2f   : > { %s181_s26 = sand.u32 1, %s997_s17   ;;  %s624_s6 = sshll.u32 %s1001_s18, 10 }
  0x30   : > { %p1133_p12 = por %p1342_p10, %p39_p2  ;;  %s610_s7 = sshll.u32 %s181_s26, 6 }
  0x31   : > { %s1142_s10 = scalar_lea.hbm %s1330_s0, %s624_s6  ;;  %s185_s25 = scalar_lea.vmem [#allocation2], %s610_s7 }
  0x32   : > { %s192_s28 = sshll.u32 %s185_s25, 4  ;;  %p1144_p11 = pnand %p773_p6, %p41_p8  ;;  %s1148_s28 = int_to_ptr.vmem [resolvable:$true] %s192_s28 }
  0x33   : > { %s1150_s11 = scalar_lea.sflag [#allocation3], %s181_s26  ;;  %s841_s14 = scalar_lea.hbm %s1142_s10, 1024 }
  0x34   : > { %p842_p13 = scmp.ne.s32.totalorder %s1142_s10, %s841_s14  ;;  %p843_p0 = pneg %p1144_p11 }
  0x35   : > { %s846_s7 = scalar_lea.hbm %s1330_s0, 2048  ;;  %p847_p7 = scmp.lt.u32.totalorder %s1142_s10, %s1330_s0 }
  0x36   : > { %p844_p3 = pnand %p843_p0, %p842_p13  ;;  %p848_p9 = scmp.lt.u32.totalorder %s846_s7, %s841_s14 }
  0x37   : > { %p850_p2 = scmp.lt.u32.totalorder %s841_s14, %s1142_s10 }
  0x38   : > { %p845_p5 = pneg %p844_p3  ;;  %p849_p1 = por %p848_p9, %p847_p7 }
  0x3a   : > { %p851_p4 = por %p850_p2, %p849_p1 }
  0x3c   : > { %p852_p6 = pnand %p851_p4, %p845_p5 }
  0x3e   : > { %855 = shalt.err (!%p852_p6)
}
  0x3f   : > { %s856_s26 = scalar_lea.vmem %s1148_s28, 1024  ;;  %s1006_s25 = smov [#allocation2]  }
  0x40   : > { %p857_p8 = scmp.ne.s32.totalorder %s1148_s28, %s856_s26  ;;  %s861_s24 = sshll.u32 %s1006_s25, 4  ;;  %s862_s24 = int_to_ptr.vmem [resolvable:$false] %s861_s24 }
  0x41   : > { %s863_s6 = scalar_lea.vmem %s862_s24, 2048  ;;  %p864_p3 = scmp.lt.s32.totalorder %s1148_s28, %s862_s24 }
  0x42   : > { %p859_p10 = pnand %p857_p8, %p843_p0  ;;  %p865_p7 = scmp.lt.s32.totalorder %s863_s6, %s856_s26 }
  0x44   : > { %p860_p13 = pneg %p859_p10  ;;  %p866_p9 = por %p865_p7, %p864_p3 }
  0x46   : > { %p867_p1 = pnand %p866_p9, %p860_p13 }
  0x48   : > { %870 = shalt.err (!%p867_p1)
}
  0x49   : > { %761 = dma.hbm_to_vmem [thread:$0]  (!%p1144_p11), %s1142_s10, 1024, %s1148_s28, %s1150_s11, %s1004_s12, %s1004_s12, %s1005_s13  }
  0x4a   : > { %p1345_p0 = scmp.ne.s32.totalorder %s1340_s23, 0 }
  0x4b   : > { %s1184_s14 = sand.u32 (!%p1345_p0), 1, %s993_s16   ;;  %p1346_p5 = scmp.ne.s32.totalorder (!%p1345_p0), %s1338_s21, 0 }
  0x4c   : > { %204 = sbr.rel (%p1345_p0) target bundleno = 410 (0x19a), region = 28  ;;  %s614_s7 = sshll.u32 (!%p1345_p0), %s1184_s14, 6 }
  0x4d   : > { %s207_s8 = scalar_lea.sflag (!%p1345_p0), [#allocation3], %s1184_s14  ;;  %s1190_s29 = scalar_lea.vmem (!%p1345_p0), [#allocation2], %s614_s7 }
  0x53   : > { %972 = dma.done.wait (%p1346_p5), %s207_s8, 1024  }
  0x54   : > { %974 = vsyncadd (%p1346_p5), %s207_s8, 4294966272  ;;  %p1347_p11 = scmp.eq.s32.totalorder %s1058_s19, 0 }
  0x56   : > { %976 = dma.done.wait (%p1347_p11), [#allocation6], 2048   ;;  %p1348_p2 = pmov %p1347_p11 }
  0x57   : > { %v257_v0 = vld [vmem:[#allocation5] sm:$0xff]  ;;  %v258_v1 = vld [vmem:[#allocation5 + $0x8] sm:$0xff]  ;;  %v259_v2 = vld [vmem:[#allocation5 + $0x10] sm:$0xff]  ;;  %s234_s21 = scalar_lea.vmem [#allocation7], %s614_s7  ;;  %s625_s12 = sshll.u32 %s1058_s19, 10 }
  0x58   : > { %978 = vsyncadd (%p1348_p2), [#allocation6], 4294965248  ;;  %v694_v3 = vpack.c.bf16 %v258_v1, %v257_v0  ;;  %v260_v4 = vld [vmem:[#allocation5 + $0x18] sm:$0xff]  ;;  %v261_v6 = vld [vmem:[#allocation5 + $0x20] sm:$0xff]  ;;  %s444_s23 = sshll.u32 %s234_s21, 4  ;;  %s1216_s28 = scalar_lea.hbm %s1332_s2, %s625_s12  ;;  %s1211_s23 = int_to_ptr.vmem [resolvable:$true] %s444_s23 }
  0x59   : > { %v698_v5 = vpack.c.bf16 %v260_v4, %v259_v2  ;;  %v262_v7 = vld [vmem:[#allocation5 + $0x28] sm:$0xff]  ;;  %v249_v9 = vld [vmem:[%s1190_s29] sm:$0xff]  ;;  %v263_v10 = vld [vmem:[#allocation5 + $0x30] sm:$0xff]  ;;  %s423_s11 = scalar_lea.sflag [#allocation4], %s1184_s14  ;;  %s871_s9 = scalar_lea.vmem %s1211_s23, 1024 }
  0x5a   : > { %695 = vmatprep.subr.bf16.mxu0 %v694_v3  ;;  %726 = vmatprep.subr.bf16.mxu1 %v694_v3  ;;  %v702_v8 = vpack.c.bf16 %v262_v7, %v261_v6  ;;  %v264_v11 = vld [vmem:[#allocation5 + $0x38] sm:$0xff]  ;;  %v253_v12 = vld [vmem:[%s1190_s29 + $0x20] sm:$0xff]  ;;  %v266_v15 = vld [vmem:[#allocation5 + $0x48] sm:$0xff]  ;;  %p872_p4 = scmp.ne.s32.totalorder %s1211_s23, %s871_s9  ;;  %s1007_s26 = smov [#allocation7]  }
  0x5b   : > { %697 = vmatpush3.bf16.msra.mxu0 %v694_v3  ;;  %734 = vmatpush3.bf16.msra.mxu1 %v694_v3  ;;  %v706_v13 = vpack.c.bf16 %v264_v11, %v263_v10  ;;  %v265_v14 = vld [vmem:[#allocation5 + $0x40] sm:$0xff]  ;;  %v267_v17 = vld [vmem:[#allocation5 + $0x50] sm:$0xff]  ;;  %v268_v18 = vld [vmem:[#allocation5 + $0x58] sm:$0xff]  ;;  %s875_s25 = sshll.u32 %s1007_s26, 4  ;;  %s876_s25 = int_to_ptr.vmem [resolvable:$false] %s875_s25 }
  0x5c   : > { %699 = vmatprep.subr.bf16.mxu0 %v698_v5  ;;  %727 = vmatprep.subr.bf16.mxu1 %v698_v5  ;;  %v710_v16 = vpack.c.bf16 %v266_v15, %v265_v14  ;;  %v714_v19 = vpack.c.bf16 %v268_v18, %v267_v17  ;;  %v269_v20 = vld [vmem:[#allocation5 + $0x60] sm:$0xff]  ;;  %v270_v21 = vld [vmem:[#allocation5 + $0x68] sm:$0xff]  ;;  %v271_v23 = vld [vmem:[#allocation5 + $0x70] sm:$0xff]  ;;  %p873_p6 = pnand %p872_p4, %p1133_p12  ;;  %s877_s24 = scalar_lea.vmem %s876_s25, 2048 }
  0x5d   : > { %682 = vmatprep.mubr.f32.mxu0 %v249_v9  ;;  %688 = vmatprep.mubr.f32.mxu1 %v253_v12  ;;  %v718_v22 = vpack.c.bf16 %v270_v21, %v269_v20  ;;  %v272_v24 = vld [vmem:[#allocation5 + $0x78] sm:$0xff]  ;;  %v250_v26 = vld [vmem:[%s1190_s29 + $0x8] sm:$0xff]  ;;  %v251_v28 = vld [vmem:[%s1190_s29 + $0x10] sm:$0xff]  ;;  %p878_p10 = scmp.lt.s32.totalorder %s1211_s23, %s876_s25  ;;  %p879_p13 = scmp.lt.s32.totalorder %s877_s24, %s871_s9 }
  0x5e   : > { %v722_v25 = vpack.c.bf16 %v272_v24, %v271_v23  ;;  %v254_v27 = vld [vmem:[%s1190_s29 + $0x28] sm:$0xff]  ;;  %v255_v29 = vld [vmem:[%s1190_s29 + $0x30] sm:$0xff]  ;;  %v252_v30 = vld [vmem:[%s1190_s29 + $0x18] sm:$0xff]  ;;  %p874_p8 = pneg %p873_p6 }
  0x5f   : > { %701 = vmatpush3.bf16.msra.mxu0 %v698_v5  ;;  %735 = vmatpush3.bf16.msra.mxu1 %v698_v5  ;;  %v256_v31 = vld [vmem:[%s1190_s29 + $0x38] sm:$0xff]  ;;  %p880_p3 = por %p879_p13, %p878_p10 }
  0x60   : > { %703 = vmatprep.subr.bf16.mxu0 %v702_v8  ;;  %728 = vmatprep.subr.bf16.mxu1 %v702_v8 }
  0x61   : > { %p881_p7 = pnand %p880_p3, %p874_p8 }
  0x63   : > { %705 = vmatpush3.bf16.msra.mxu0 %v702_v8  ;;  %736 = vmatpush3.bf16.msra.mxu1 %v702_v8 }
  0x64   : > { %707 = vmatprep.subr.bf16.mxu0 %v706_v13  ;;  %729 = vmatprep.subr.bf16.mxu1 %v706_v13 }
  0x67   : > { %709 = vmatpush3.bf16.msra.mxu0 %v706_v13  ;;  %737 = vmatpush3.bf16.msra.mxu1 %v706_v13 }
  0x68   : > { %711 = vmatprep.subr.bf16.mxu0 %v710_v16  ;;  %730 = vmatprep.subr.bf16.mxu1 %v710_v16 }
  0x6b   : > { %713 = vmatpush3.bf16.msra.mxu0 %v710_v16  ;;  %738 = vmatpush3.bf16.msra.mxu1 %v710_v16 }
  0x6c   : > { %715 = vmatprep.subr.bf16.mxu0 %v714_v19  ;;  %731 = vmatprep.subr.bf16.mxu1 %v714_v19 }
  0x6f   : > { %717 = vmatpush3.bf16.msra.mxu0 %v714_v19  ;;  %739 = vmatpush3.bf16.msra.mxu1 %v714_v19 }
  0x70   : > { %719 = vmatprep.subr.bf16.mxu0 %v718_v22  ;;  %732 = vmatprep.subr.bf16.mxu1 %v718_v22 }
  0x73   : > { %721 = vmatpush3.bf16.msra.mxu0 %v718_v22  ;;  %740 = vmatpush3.bf16.msra.mxu1 %v718_v22 }
  0x74   : > { %723 = vmatprep.subr.bf16.mxu0 %v722_v25  ;;  %733 = vmatprep.subr.bf16.mxu1 %v722_v25 }
  0x77   : > { %725 = vmatpush3.bf16.msra.mxu0 %v722_v25  ;;  %741 = vmatpush3.bf16.msra.mxu1 %v722_v25 }
  0x7a   : > { %683 = vmatmul.mubr.f32.vlgmr.msra.gmra.mrb[0].mxu0 %v250_v26  ;;  %689 = vmatmul.mubr.f32.vlgmr.msra.gmra.mrb[0].mxu1 %v254_v27 }
  0x7b   : > { %685 = vmatprep.mubr.f32.mxu0 %v251_v28  ;;  %691 = vmatprep.mubr.f32.mxu1 %v255_v29 }
  0x7e   : > { %686 = vmatmul.mubr.f32.gmra.mrb[2].mxu0 %v252_v30  ;;  %692 = vmatmul.mubr.f32.gmra.mrb[2].mxu1 %v256_v31 }
 0x14d   : > { %v684_v32 = vpop.f32.mrb[0].mxu0  ;;  %v690_v33 = vpop.f32.mrb[0].mxu1 }
 0x14e   : > { %v393_v34 = vmul.f32 %v684_v32, %v684_v32  ;;  %415 = vst [vmem:[%s234_s21 + $0x8] sm:$0xff] %v684_v32  ;;  %v339_v35 = vpop.f32.mrb[1].mxu0  ;;  %419 = vst [vmem:[%s234_s21 + $0x28] sm:$0xff] %v690_v33  ;;  %v359_v36 = vpop.f32.mrb[1].mxu1 }
 0x14f   : > { %v378_v37 = vadd.f32 %v684_v32, %v339_v35  ;;  %v392_v38 = vmul.f32 %v339_v35, %v339_v35  ;;  %414 = vst [vmem:[%s234_s21] sm:$0xff] %v339_v35  ;;  %418 = vst [vmem:[%s234_s21 + $0x20] sm:$0xff] %v359_v36 }
 0x151   : > { %v400_v39 = vadd.f32 %v393_v34, %v392_v38  ;;  %v687_v40 = vpop.f32.mrb[2].mxu0  ;;  %v693_v41 = vpop.f32.mrb[2].mxu1 }
 0x152   : > { %417 = vst [vmem:[%s234_s21 + $0x18] sm:$0xff] %v687_v40  ;;  %v349_v42 = vpop.f32.mrb[3].mxu0  ;;  %421 = vst [vmem:[%s234_s21 + $0x38] sm:$0xff] %v693_v41  ;;  %v369_v43 = vpop.f32.mrb[3].mxu1 }
 0x153   : > { %v379_v44 = vadd.f32 %v378_v37, %v349_v42  ;;  %v394_v45 = vmul.f32 %v349_v42, %v349_v42  ;;  %416 = vst [vmem:[%s234_s21 + $0x10] sm:$0xff] %v349_v42  ;;  %420 = vst [vmem:[%s234_s21 + $0x30] sm:$0xff] %v369_v43 }
 0x154   : > { %884 = shalt.err (!%p881_p7)
}
 0x155   : > { %s885_s6 = scalar_lea.hbm %s1216_s28, 1024  ;;  %s889_s29 = scalar_lea.hbm %s1332_s2, 2048 }
 0x156   : > { %p886_p9 = scmp.ne.s32.totalorder %s1216_s28, %s885_s6  ;;  %p890_p5 = scmp.lt.u32.totalorder %s1216_s28, %s1332_s2 }
 0x157   : > { %p891_p11 = scmp.lt.u32.totalorder %s889_s29, %s885_s6  ;;  %p893_p4 = scmp.lt.u32.totalorder %s885_s6, %s1216_s28 }
 0x158   : > { %p887_p1 = pnand %p886_p9, %p1133_p12 }
 0x159   : > { %p892_p2 = por %p891_p11, %p890_p5 }
 0x15a   : > { %p888_p0 = pneg %p887_p1 }
 0x15b   : > { %p894_p6 = por %p893_p4, %p892_p2 }
 0x15d   : > { %p895_p8 = pnand %p894_p6, %p888_p0 }
 0x15f   : > { %898 = shalt.err (!%p895_p8)
}
 0x160   : > { %s1008_s13 = smov 128   ;;  %s1009_s10 = smov 8   ;;  %v395_v46 = vmul.f32 %v687_v40, %v687_v40  ;;  %v380_v47 = vadd.f32 %v687_v40, %v379_v44  ;;  %v401_v48 = vadd.f32 %v400_v39, %v394_v45  ;;  %v396_v49 = vmul.f32 %v359_v36, %v359_v36 }
 0x161   : > { %748 = dma.vmem_to_hbm [thread:$0]  (%p1133_p12), %s1211_s23, 1024, %s1216_s28, %s423_s11, %s1008_s13, %s1008_s13, %s1009_s10   ;;  %v397_v52 = vmul.f32 %v690_v33, %v690_v33  ;;  %v398_v55 = vmul.f32 %v369_v43, %v369_v43  ;;  %v399_v58 = vmul.f32 %v693_v41, %v693_v41 }
 0x162   : > { %v402_v50 = vadd.f32 %v401_v48, %v395_v46  ;;  %v381_v51 = vadd.f32 %v380_v47, %v359_v36  ;;  %s427_s23 = sand.u32 1, %s1058_s19   ;;  %s620_s28 = sshll.u32 %s1058_s19, 4 }
 0x163   : > { %s240_s11 = scalar_lea.vmem [#allocation8], %s1184_s14  ;;  %s246_s26 = scalar_lea.vmem [#allocation10], %s1184_s14 }
 0x164   : > { %v403_v53 = vadd.f32 %v402_v50, %v396_v49  ;;  %v382_v54 = vadd.f32 %v690_v33, %v381_v51  ;;  %s460_s9 = sshll.u32 %s240_s11, 4  ;;  %s473_s25 = sshll.u32 %s246_s26, 4  ;;  %s1253_s9 = int_to_ptr.vmem [resolvable:$true] %s460_s9  ;;  %s1260_s25 = int_to_ptr.vmem [resolvable:$true] %s473_s25 }
 0x165   : > { %s1251_s7 = scalar_lea.hbm %s1333_s3, %s620_s28  ;;  %s1258_s29 = scalar_lea.hbm %s1334_s4, %s620_s28 }
 0x166   : > { %v383_v56 = vadd.f32 %v382_v54, %v369_v43  ;;  %v404_v57 = vadd.f32 %v403_v53, %v397_v52  ;;  %s1262_s21 = scalar_lea.sflag [#allocation9], %s427_s23  ;;  %s899_s12 = scalar_lea.vmem %s1253_s9, 16 }
 0x167   : > { %p900_p10 = scmp.ne.s32.totalorder %s1253_s9, %s899_s12  ;;  %s1010_s13 = smov [#allocation8]  }
 0x168   : > { %v384_v59 = vadd.f32 %v693_v41, %v383_v56  ;;  %v405_v60 = vadd.f32 %v404_v57, %v398_v55  ;;  %s903_s10 = sshll.u32 %s1010_s13, 4  ;;  %s904_s10 = int_to_ptr.vmem [resolvable:$false] %s903_s10 }
 0x169   : > { %p901_p13 = pnand %p900_p10, %p1133_p12  ;;  %s905_s24 = scalar_lea.vmem %s904_s10, 32 }
 0x16a   : > { %v385_v61 = vrot.slane %v384_v59, 4  ;;  %v406_v62 = vadd.f32 %v405_v60, %v399_v58  ;;  %p906_p7 = scmp.lt.s32.totalorder %s1253_s9, %s904_s10  ;;  %p907_p9 = scmp.lt.s32.totalorder %s905_s24, %s899_s12 }
 0x16b   : > { %p902_p3 = pneg %p901_p13 }
 0x16c   : > { %v386_v63 = vadd.f32 %v385_v61, %v384_v59  ;;  %v407_v0 = vrot.slane %v406_v62, 4  ;;  %p908_p1 = por %p907_p9, %p906_p7 }
 0x16e   : > { %v387_v1 = vrot.slane %v386_v63, 2  ;;  %v408_v2 = vadd.f32 %v407_v0, %v406_v62  ;;  %p909_p0 = pnand %p908_p1, %p902_p3 }
 0x170   : > { %v388_v3 = vadd.f32 %v387_v1, %v386_v63  ;;  %v409_v4 = vrot.slane %v408_v2, 2 }
 0x172   : > { %v389_v5 = vrot.slane %v388_v3, 1  ;;  %v410_v6 = vadd.f32 %v409_v4, %v408_v2 }
 0x174   : > { %v390_v7 = vadd.f32 %v389_v5, %v388_v3  ;;  %v411_v8 = vrot.slane %v410_v6, 1 }
 0x176   : > { %v412_v9 = vadd.f32 %v411_v8, %v410_v6  ;;  %391 = vst [vmem:[%s240_s11] sm:$0x1] %v390_v7 }
 0x177   : > { %912 = shalt.err (!%p909_p0)
}
 0x178   : > { %s913_s23 = scalar_lea.hbm %s1251_s7, 16  ;;  %s917_s6 = scalar_lea.hbm %s1333_s3, 32 }
 0x179   : > { %p914_p5 = scmp.ne.s32.totalorder %s1251_s7, %s913_s23  ;;  %p918_p4 = scmp.lt.u32.totalorder %s1251_s7, %s1333_s3 }
 0x17a   : > { %p919_p6 = scmp.lt.u32.totalorder %s917_s6, %s913_s23  ;;  %p921_p10 = scmp.lt.u32.totalorder %s913_s23, %s1251_s7 }
 0x17b   : > { %p915_p11 = pnand %p914_p5, %p1133_p12 }
 0x17c   : > { %p920_p8 = por %p919_p6, %p918_p4 }
 0x17d   : > { %p916_p2 = pneg %p915_p11 }
 0x17e   : > { %p922_p13 = por %p921_p10, %p920_p8 }
 0x180   : > { %p923_p3 = pnand %p922_p13, %p916_p2 }
 0x182   : > { %926 = shalt.err (!%p923_p3)
}
 0x183   : > { %749 = dma.vmem_to_hbm [thread:$0]  (%p1133_p12), %s1253_s9, 16, %s1251_s7, %s1262_s21   ;;  %413 = vst [vmem:[%s246_s26] sm:$0x1] %v412_v9 }
 0x184   : > { %s927_s12 = scalar_lea.vmem %s1260_s25, 16  ;;  %s1011_s13 = smov [#allocation10]  }
 0x185   : > { %p928_p7 = scmp.ne.s32.totalorder %s1260_s25, %s927_s12  ;;  %s931_s10 = sshll.u32 %s1011_s13, 4  ;;  %s932_s10 = int_to_ptr.vmem [resolvable:$false] %s931_s10 }
 0x186   : > { %s933_s24 = scalar_lea.vmem %s932_s10, 32  ;;  %p934_p0 = scmp.lt.s32.totalorder %s1260_s25, %s932_s10 }
 0x187   : > { %p929_p9 = pnand %p928_p7, %p1133_p12  ;;  %p935_p5 = scmp.lt.s32.totalorder %s933_s24, %s927_s12 }
 0x189   : > { %p930_p1 = pneg %p929_p9  ;;  %p936_p11 = por %p935_p5, %p934_p0 }
 0x18b   : > { %p937_p2 = pnand %p936_p11, %p930_p1 }
 0x18d   : > { %940 = shalt.err (!%p937_p2)
}
 0x18e   : > { %s941_s14 = scalar_lea.hbm %s1258_s29, 16  ;;  %s945_s7 = scalar_lea.hbm %s1334_s4, 32 }
 0x18f   : > { %p942_p4 = scmp.ne.s32.totalorder %s1258_s29, %s941_s14  ;;  %p946_p10 = scmp.lt.u32.totalorder %s1258_s29, %s1334_s4 }
 0x190   : > { %p947_p13 = scmp.lt.u32.totalorder %s945_s7, %s941_s14  ;;  %p949_p7 = scmp.lt.u32.totalorder %s941_s14, %s1258_s29 }
 0x191   : > { %p943_p6 = pnand %p942_p4, %p1133_p12 }
 0x192   : > { %p948_p3 = por %p947_p13, %p946_p10 }
 0x193   : > { %p944_p8 = pneg %p943_p6 }
 0x194   : > { %p950_p9 = por %p949_p7, %p948_p3 }
 0x196   : > { %p951_p1 = pnand %p950_p9, %p944_p8 }
 0x198   : > { %954 = shalt.err (!%p951_p1)
}
 0x199   : > { %750 = dma.vmem_to_hbm [thread:$0]  (%p1133_p12), %s1260_s25, 16, %s1258_s29, %s1262_s21  }
 0x19a PF: > { %s485_s11 = sand.u32 1, %s989_s15   ;;  %p1349_p0 = scmp.ne.s32.totalorder %s1339_s22, 0 }
 0x19b   : > { %p1350_p5 = scmp.ge.s32.totalorder %s1001_s18, 2  ;;  %s486_s6 = scalar_lea.sflag [#allocation4], %s485_s11 }
 0x19d   : > { %p763_p11 = pnand %p1350_p5, %p1349_p0 }
 0x19f   : > { %980 = dma.done.wait (!%p763_p11), %s486_s6, 1024  }
 0x1a0   : > { %982 = vsyncadd (!%p763_p11), %s486_s6, 4294966272  ;;  %s494_s19 = sand.u32 1, %s606_s20  }
 0x1a1   : > { %s495_s8 = scalar_lea.sflag [#allocation9], %s494_s19 }
 0x1a2   : > { %984 = dma.done.wait (!%p763_p11), %s495_s8, 32  }
 0x1a3   : > { %986 = vsyncadd (!%p763_p11), %s495_s8, 4294967264  ;;  %p22_p12 = scmp.ge.s32.totalorder %s1095_s27, 4   ;;  %s1351_s15 = smov %s993_s16 }
 0x1a4   : > { %s1352_s16 = smov %s997_s17  ;;  %s1353_s17 = smov %s1129_s30 }
 0x1a5   : > { %s1354_s18 = smov %s1095_s27  ;;  %24 = sbr.rel (!%p22_p12) target bundleno = 8 (0x8), region = 109 }
 0x1ac   :  { %507 = vsyncpa [#allocation3], 1 }
 0x1ad   :  { %509 = vsyncpa [#allocation3 + $0x1], 1 }
 0x1ae   :  { %510 = vsyncpa [#allocation6], 1 }
 0x1af   :  { %511 = vsyncpa [#allocation4], 1 }
 0x1b0   :  { %513 = vsyncpa [#allocation4 + $0x1], 1 }
 0x1b1   :  { %514 = vsyncpa [#allocation9], 1 }
 0x1b2   :  { %516 = vsyncpa [#allocation9 + $0x1], 1 }

</bundles_post_ra>
